<compile_context>
chip_gen: v5e
topology: v5e:2x2
jax: 0.10.0
libtpu: 0.0.40
codegen_flags: <defaults>
</compile_context>

<pallas_src>
import math

import jax
import jax.numpy as jnp
from jax.scipy.linalg import block_diag
from jax.experimental import pallas as pl
from jax.experimental.pallas import tpu as pltpu


D_MODEL = 1            # MyEnsemble: MultiHeadAttention(d_model=1, num_heads=1)
NUM_HEADS = 1
HEAD_DIM = D_MODEL // NUM_HEADS      # = 1
FEAT = 32              # cnn_m output width == attention sequence length
NB_CLASSES = 3


def _ensemble_head_kernel(scal_ref, f_row_ref, f_col_ref, bias_ref,
                          wfc_ref, bfc_ref, wlo_ref, blo_ref, out_ref):
    # Scalar params of the four Linear(1,1) layers (Q, K, V, mha_linear).
    wq = scal_ref[0]
    bq = scal_ref[1]
    wk = scal_ref[2]
    bk = scal_ref[3]
    wv = scal_ref[4]
    bv = scal_ref[5]
    wo = scal_ref[6]
    bo = scal_ref[7]

    f_row = f_row_ref[...]            # (1, n)  n = B*32 flattened (batch, seq)
    f_col = f_col_ref[...]            # (n, 1)  same data, column layout

    # Q/K/V projections (Linear(1,1) => scalar affine). The 1/sqrt(head_dim)
    # score scale is already folded into wq/bq at prep time.
    q_row = f_row * wq + bq           # queries along lanes
    k_col = f_col * wk + bk           # keys along sublanes
    v_col = f_col * wv + bv

    # scores^T[j, i] = q_i * k_j ; additive block-diagonal bias (-1e9 across
    # batch items) keeps each query inside its own batch item.
    s = k_col * q_row + bias_ref[...]                           # (n, n)

    # softmax over keys (sublane axis) with the EUP approx reciprocal.
    m = jnp.max(s, axis=0, keepdims=True)                       # (1, n)
    p = jnp.exp(s - m)
    attn = p * pl.reciprocal(jnp.sum(p, axis=0, keepdims=True), approx=True)

    # attention output (single head => concat is identity) + mha_linear;
    # dropout is inference-mode identity.
    o_row = jnp.sum(attn * v_col, axis=0, keepdims=True)        # (1, n)
    proj = o_row * wo + bo                                      # (1, n)

    # x.view(B, -1) -> fc -> dropout -> layer_out: both Linears were expanded
    # host-side into block-diagonal weights over the flattened batch, so this
    # is two lane-dense MXU matmuls and one unmasked (1, 128) store.
    y = jnp.dot(proj, wfc_ref[...],
                preferred_element_type=jnp.float32) + bfc_ref[...]
    z = jnp.dot(y, wlo_ref[...],
                preferred_element_type=jnp.float32) + blo_ref[...]
    out_ref[...] = z.astype(out_ref.dtype)


def prepare_ensemble_params(wq, bq, wk, bk, wv, bv, wo, bo, wfc, bfc, wlo, blo,
                            *, batch, seq=FEAT, nb_classes=NB_CLASSES,
                            head_dim=HEAD_DIM):
    """One-time host-side repack. All weights are in `y = x @ W + b` layout."""
    n = batch * seq
    scale = 1.0 / math.sqrt(head_dim)    # = 1.0 here; folded for generality
    scalars = jnp.array(
        [wq[0, 0] * scale, bq[0] * scale,
         wk[0, 0], bk[0],
         wv[0, 0], bv[0],
         wo[0, 0], bo[0]], jnp.float32)                                   # (8,)

    # block-diagonal attention bias: 0 within a batch item, -1e9 across.
    r = jnp.arange(n)
    same_batch = (r[:, None] // seq) == (r[None, :] // seq)
    attn_bias = jnp.where(same_batch, 0.0, -1e9).astype(jnp.float32)      # (n, n)

    # fc (Linear(32, 32)) expanded over the flattened batch.
    wfc_big = block_diag(*([wfc] * batch)).astype(jnp.float32)            # (n, B*32)
    bfc_big = jnp.tile(bfc[None, :], (1, batch)).astype(jnp.float32)      # (1, B*32)

    # layer_out (Linear(32, 3)) zero-padded so the kernel's final store is a
    # lane-dense (1, B*nbp) = (1, 128) unmasked store.
    nbp = max(nb_classes, -(-128 // batch))
    wlo_pad = jnp.zeros((wlo.shape[0], nbp),
                        jnp.float32).at[:, :nb_classes].set(wlo)
    blo_pad = jnp.zeros((nbp,), jnp.float32).at[:nb_classes].set(blo)
    wlo_big = block_diag(*([wlo_pad] * batch)).astype(jnp.float32)        # (B*32, B*nbp)
    blo_big = jnp.tile(blo_pad[None, :], (1, batch)).astype(jnp.float32)  # (1, B*nbp)
    return scalars, attn_bias, wfc_big, bfc_big, wlo_big, blo_big, nbp


def ensemble_head(features, params, nb_classes=NB_CLASSES):
    """features: (B, 32) float32 = cnn_m(x) output. Returns (B, nb_classes)."""
    scalars, attn_bias, wfc_big, bfc_big, wlo_big, blo_big, nbp = params
    B, F = features.shape
    n = B * F
    f_row = features.reshape(1, n)        # host-side views, zero kernel cost
    f_col = features.reshape(n, 1)

    smem = pl.BlockSpec(memory_space=pltpu.MemorySpace.SMEM)
    vmem = lambda: pl.BlockSpec(memory_space=pltpu.MemorySpace.VMEM)

    # No grid: the whole post-backbone head is one invocation. At production
    # sizes, reintroduce a ("parallel",) grid over batch and tile the (n, n)
    # score matrix, with pltpu.CompilerParams(vmem_limit_bytes=...).
    out = pl.pallas_call(
        _ensemble_head_kernel,
        out_shape=jax.ShapeDtypeStruct((1, B * nbp), jnp.float32),
        in_specs=[smem] + [vmem() for _ in range(7)],
        out_specs=vmem(),
    )(scalars, f_row, f_col, attn_bias, wfc_big, bfc_big, wlo_big, blo_big)
    return out.reshape(B, nbp)[:, :nb_classes]


def _reference(features, wq, bq, wk, bk, wv, bv, wo, bo, wfc, bfc, wlo, blo,
               head_dim=HEAD_DIM):
    """Pure-JAX mirror of the PyTorch forward (dropout = identity)."""
    x = features[:, :, None]                              # torch.unsqueeze(x, 2)
    q = x @ wq + bq                                       # (B, 32, 1), one head
    k = x @ wk + bk
    v = x @ wv + bv
    scores = jnp.einsum("bqd,bkd->bqk", q, k) / math.sqrt(head_dim)
    attn = jax.nn.softmax(scores, axis=-1)
    o = jnp.einsum("bqk,bkd->bqd", attn, v)               # concat of 1 head
    proj = o @ wo + bo                                    # mha_linear
    flat = proj.reshape(features.shape[0], -1)            # x.view(B, -1)
    y = flat @ wfc + bfc                                  # fc
    return y @ wlo + blo                                  # layer_out


def _init_linear(key, in_f, out_f):
    """Deterministic init mimicking nn.Linear defaults, in `x @ W` layout."""
    k1, k2 = jax.random.split(key)
    bound = 1.0 / math.sqrt(in_f)
    w = jax.random.uniform(k1, (in_f, out_f), jnp.float32, -bound, bound)
    b = jax.random.uniform(k2, (out_f,), jnp.float32, -bound, bound)
    return w, b


if __name__ == "__main__":
    key = jax.random.PRNGKey(0)
    B = 2
    ks = jax.random.split(key, 7)

    # Stand-in for the (B, 32) output of the frozen ConvNeXt-base backbone.
    features = jax.random.normal(ks[0], (B, FEAT), jnp.float32)

    wq, bq = _init_linear(ks[1], D_MODEL, HEAD_DIM)       # linear_Qs[0]: Linear(1, 1)
    wk, bk = _init_linear(ks[2], D_MODEL, HEAD_DIM)       # linear_Ks[0]
    wv, bv = _init_linear(ks[3], D_MODEL, HEAD_DIM)       # linear_Vs[0]
    wo, bo = _init_linear(ks[4], D_MODEL, D_MODEL)        # mha_linear: Linear(1, 1)
    wfc, bfc = _init_linear(ks[5], FEAT * D_MODEL, 32)    # fc: Linear(32, 32)
    wlo, blo = _init_linear(ks[6], 32, NB_CLASSES)        # layer_out: Linear(32, 3)

    params = prepare_ensemble_params(wq, bq, wk, bk, wv, bv, wo, bo,
                                     wfc, bfc, wlo, blo, batch=B)
    out = ensemble_head(features, params)
    out = jax.block_until_ready(out)

    ref = _reference(features, wq, bq, wk, bk, wv, bv, wo, bo,
                     wfc, bfc, wlo, blo)
    assert out.shape == (B, NB_CLASSES)
    # approx-EUP reciprocal in the softmax => slightly loosened tolerance
    assert jnp.allclose(out, ref, atol=2e-2, rtol=2e-2), "mismatch vs reference"

    print("KERNEL_OK")
</pallas_src>

<mosaic_0001>
module attributes {stable_mosaic.version = 11 : i64} {
  func.func @_ensemble_head_kernel(%arg0: memref<8xf32, #tpu.memory_space<smem>>, %arg1: memref<1x64xf32, #tpu.memory_space<vmem>>, %arg2: memref<64x1xf32, #tpu.memory_space<vmem>>, %arg3: memref<64x64xf32, #tpu.memory_space<vmem>>, %arg4: memref<64x64xf32, #tpu.memory_space<vmem>>, %arg5: memref<1x64xf32, #tpu.memory_space<vmem>>, %arg6: memref<64x128xf32, #tpu.memory_space<vmem>>, %arg7: memref<1x128xf32, #tpu.memory_space<vmem>>, %arg8: memref<1x128xf32, #tpu.memory_space<vmem>>) attributes {dimension_semantics = [], scalar_prefetch = 0 : i64, scratch_operands = 0 : i64, tpu.core_type = #tpu.core_type<tc>} {
    %c0 = arith.constant 0 : index
    %0 = memref.load %arg0[%c0] : memref<8xf32, #tpu.memory_space<smem>>
    %c1 = arith.constant 1 : index
    %1 = memref.load %arg0[%c1] : memref<8xf32, #tpu.memory_space<smem>>
    %c2 = arith.constant 2 : index
    %2 = memref.load %arg0[%c2] : memref<8xf32, #tpu.memory_space<smem>>
    %c3 = arith.constant 3 : index
    %3 = memref.load %arg0[%c3] : memref<8xf32, #tpu.memory_space<smem>>
    %c4 = arith.constant 4 : index
    %4 = memref.load %arg0[%c4] : memref<8xf32, #tpu.memory_space<smem>>
    %c5 = arith.constant 5 : index
    %5 = memref.load %arg0[%c5] : memref<8xf32, #tpu.memory_space<smem>>
    %c6 = arith.constant 6 : index
    %6 = memref.load %arg0[%c6] : memref<8xf32, #tpu.memory_space<smem>>
    %c7 = arith.constant 7 : index
    %7 = memref.load %arg0[%c7] : memref<8xf32, #tpu.memory_space<smem>>
    %c0_0 = arith.constant 0 : index
    %c0_1 = arith.constant 0 : index
    %8 = vector.load %arg1[%c0_0, %c0_1] : memref<1x64xf32, #tpu.memory_space<vmem>>, vector<1x64xf32>
    %c0_2 = arith.constant 0 : index
    %c0_3 = arith.constant 0 : index
    %9 = vector.load %arg2[%c0_2, %c0_3] : memref<64x1xf32, #tpu.memory_space<vmem>>, vector<64x1xf32>
    %10 = vector.broadcast %0 : f32 to vector<1x64xf32>
    %11 = arith.mulf %8, %10 : vector<1x64xf32>
    %12 = vector.broadcast %1 : f32 to vector<1x64xf32>
    %13 = arith.addf %11, %12 : vector<1x64xf32>
    %14 = vector.broadcast %2 : f32 to vector<64x1xf32>
    %15 = arith.mulf %9, %14 : vector<64x1xf32>
    %16 = vector.broadcast %3 : f32 to vector<64x1xf32>
    %17 = arith.addf %15, %16 : vector<64x1xf32>
    %18 = vector.broadcast %4 : f32 to vector<64x1xf32>
    %19 = arith.mulf %9, %18 : vector<64x1xf32>
    %20 = vector.broadcast %5 : f32 to vector<64x1xf32>
    %21 = arith.addf %19, %20 : vector<64x1xf32>
    %22 = vector.broadcast %17 : vector<64x1xf32> to vector<64x64xf32>
    %23 = vector.broadcast %13 : vector<1x64xf32> to vector<64x64xf32>
    %24 = arith.mulf %22, %23 : vector<64x64xf32>
    %c0_4 = arith.constant 0 : index
    %c0_5 = arith.constant 0 : index
    %25 = vector.load %arg3[%c0_4, %c0_5] : memref<64x64xf32, #tpu.memory_space<vmem>>, vector<64x64xf32>
    %26 = arith.addf %24, %25 : vector<64x64xf32>
    %cst = arith.constant dense<0xFF800000> : vector<64xf32>
    %27 = vector.multi_reduction <maximumf>, %26, %cst [0] : vector<64x64xf32> to vector<64xf32>
    %28 = vector.shape_cast %27 : vector<64xf32> to vector<1x64xf32>
    %29 = vector.broadcast %28 : vector<1x64xf32> to vector<64x64xf32>
    %30 = arith.subf %26, %29 : vector<64x64xf32>
    %31 = math.exp %30 : vector<64x64xf32>
    %cst_6 = arith.constant dense<0.000000e+00> : vector<64xf32>
    %32 = vector.multi_reduction <add>, %31, %cst_6 [0] : vector<64x64xf32> to vector<64xf32>
    %33 = vector.shape_cast %32 : vector<64xf32> to vector<1x64xf32>
    %34 = tpu.reciprocal %33 {approx = true} : vector<1x64xf32> -> vector<1x64xf32>
    %35 = vector.broadcast %34 : vector<1x64xf32> to vector<64x64xf32>
    %36 = arith.mulf %31, %35 : vector<64x64xf32>
    %37 = vector.broadcast %21 : vector<64x1xf32> to vector<64x64xf32>
    %38 = arith.mulf %36, %37 : vector<64x64xf32>
    %cst_7 = arith.constant dense<0.000000e+00> : vector<64xf32>
    %39 = vector.multi_reduction <add>, %38, %cst_7 [0] : vector<64x64xf32> to vector<64xf32>
    %40 = vector.shape_cast %39 : vector<64xf32> to vector<1x64xf32>
    %41 = vector.broadcast %6 : f32 to vector<1x64xf32>
    %42 = arith.mulf %40, %41 : vector<1x64xf32>
    %43 = vector.broadcast %7 : f32 to vector<1x64xf32>
    %44 = arith.addf %42, %43 : vector<1x64xf32>
    %c0_8 = arith.constant 0 : index
    %c0_9 = arith.constant 0 : index
    %45 = vector.load %arg4[%c0_8, %c0_9] : memref<64x64xf32, #tpu.memory_space<vmem>>, vector<64x64xf32>
    %cst_10 = arith.constant dense<0.000000e+00> : vector<1x64xf32>
    %46 = tpu.matmul %44, %45, %cst_10 {dimension_numbers = #tpu.dot_dimension_numbers<[1], [0], [0], [1], [0, 0, 1, 1], [], []>} : vector<1x64xf32>, vector<64x64xf32>, vector<1x64xf32> -> vector<1x64xf32>
    %c0_11 = arith.constant 0 : index
    %c0_12 = arith.constant 0 : index
    %47 = vector.load %arg5[%c0_11, %c0_12] : memref<1x64xf32, #tpu.memory_space<vmem>>, vector<1x64xf32>
    %48 = arith.addf %46, %47 : vector<1x64xf32>
    %c0_13 = arith.constant 0 : index
    %c0_14 = arith.constant 0 : index
    %49 = vector.load %arg6[%c0_13, %c0_14] : memref<64x128xf32, #tpu.memory_space<vmem>>, vector<64x128xf32>
    %cst_15 = arith.constant dense<0.000000e+00> : vector<1x128xf32>
    %50 = tpu.matmul %48, %49, %cst_15 {dimension_numbers = #tpu.dot_dimension_numbers<[1], [0], [0], [1], [0, 0, 1, 1], [], []>} : vector<1x64xf32>, vector<64x128xf32>, vector<1x128xf32> -> vector<1x128xf32>
    %c0_16 = arith.constant 0 : index
    %c0_17 = arith.constant 0 : index
    %51 = vector.load %arg7[%c0_16, %c0_17] : memref<1x128xf32, #tpu.memory_space<vmem>>, vector<1x128xf32>
    %52 = arith.addf %50, %51 : vector<1x128xf32>
    %c0_18 = arith.constant 0 : index
    %c0_19 = arith.constant 0 : index
    %53 = vector.load %arg8[%c0_18, %c0_19] : memref<1x128xf32, #tpu.memory_space<vmem>>, vector<1x128xf32>
    tpu.vector_store %arg8[%c0_18, %c0_19], %52 {strides = array<i32>} : memref<1x128xf32, #tpu.memory_space<vmem>>, vector<1x128xf32>,
    return
  }
}

</mosaic_0001>

<bundles_post_ra>
// kernel: tpu_custom_call.1
= control target key start
LH: loop header
LB: loop body
LE: loop exit
PB: predicated region body
PF: predicated region fallthrough
CT: control target
= control target key end

     0   :  { %13 = vsyncpa [#allocation5], 0  ;;  %s747_s0 = inlined_call_operand.vmem [shape: f32[8], index: 0, kind: input, shape index: {}]   ;;  %s748_s1 = inlined_call_operand.hbm [shape: f32[1,64], index: 1, kind: input, shape index: {}]   ;;  %s749_s2 = inlined_call_operand.vmem [shape: f32[64,1], index: 2, kind: input, shape index: {}]   ;;  %s750_s3 = inlined_call_operand.vmem [shape: f32[64,64], index: 3, kind: input, shape index: {}]   ;;  %s751_s4 = inlined_call_operand.hbm [shape: f32[64,64], index: 4, kind: input, shape index: {}]   ;;  %s752_s5 = inlined_call_operand.vmem [shape: f32[1,64], index: 5, kind: input, shape index: {}]   ;;  %s753_s6 = inlined_call_operand.hbm [shape: f32[64,128], index: 6, kind: input, shape index: {}]   ;;  %s754_s7 = inlined_call_operand.vmem [shape: f32[1,128], index: 7, kind: input, shape index: {}]   ;;  %s755_s8 = inlined_call_operand.hbm [shape: f32[1,128], index: 8, kind: output, shape index: {}]  }
   0x1   :  { %14 = vsyncpa [#allocation3], 0 }
   0x2   :  { %15 = vsyncpa [#allocation8], 0  ;;  %s45_s29 = sshll.u32 %s751_s4, 4  ;;  %s46_s29 = int_to_ptr.hbm [resolvable:$true] %s45_s29 }
   0x3   :  { %16 = vsyncpa [#allocation4], 0  ;;  %s599_s30 = smov [#allocation7]   ;;  %s22_s12 = sshll.u32 %s747_s0, 4  ;;  %s23_s12 = int_to_ptr.vmem [resolvable:$true] %s22_s12 }
   0x4   :  { %s47_s9 = sshll.u32 %s599_s30, 4  ;;  %s600_s13 = smov 128   ;;  %s48_s9 = int_to_ptr.vmem [resolvable:$true] %s47_s9 }
   0x5   :  { %s601_s14 = smov 8   ;;  %s602_s15 = smov [#allocation2]  }
   0x6   :  { %53 = dma.hbm_to_vmem [thread:$0]  %s46_s29, 1024, %s48_s9, [#allocation8], %s600_s13, %s600_s13, %s601_s14  }
   0x7   :  { %25 = dma.vmem_to_smem %s23_s12, 16, %s602_s15, [#allocation5]  }
   0x8   :  { %s31_s18 = sshll.u32 %s748_s1, 4  ;;  %s603_s4 = smov [#allocation6]   ;;  %s32_s18 = int_to_ptr.hbm [resolvable:$true] %s31_s18 }
   0x9   :  { %s33_s19 = sshll.u32 %s603_s4, 4  ;;  %s60_s22 = sshll.u32 %s753_s6, 4  ;;  %s34_s19 = int_to_ptr.vmem [resolvable:$true] %s33_s19  ;;  %s61_s22 = int_to_ptr.hbm [resolvable:$true] %s60_s22 }
   0xa   :  { %36 = dma.hbm_to_vmem [thread:$0]  %s32_s18, 16, %s34_s19, [#allocation3]  }
   0xb   :  { %s604_s0 = smov [#allocation9]  }
   0xc   :  { %s62_s23 = sshll.u32 %s604_s0, 4  ;;  %s63_s23 = int_to_ptr.vmem [resolvable:$true] %s62_s23 }
   0xd   :  { %68 = dma.hbm_to_vmem [thread:$0]  %s61_s22, 1024, %s63_s23, [#allocation8], %s600_s13, %s600_s13, %s601_s14  }
   0xe   :  { %591 = dma.done.wait [#allocation5], 16  }
   0xf   :  { %592 = vsyncadd [#allocation5], 4294967280 }
  0x10   :  { %593 = dma.done.wait [#allocation3], 16  }
  0x11   :  { %594 = vsyncadd [#allocation3], 4294967280 }
  0x12   :  { %595 = dma.done.wait [#allocation8], 2048  }
  0x13   :  { %596 = vsyncadd [#allocation8], 4294965248 }
  0x14   :  { %87 = sfence }
  0x15   :  { %s446_s1 = sld [smem:[#allocation2 + $0x2]]  ;;  %v605_v0 = vmov 0   ;;  %v101_v1 = vld [vmem:[%s749_s2 + $0x20] sm:$0xff]  ;;  %v99_v2 = vld [vmem:[%s749_s2 + $0x10] sm:$0xff]  ;;  %v102_v9 = vld [vmem:[%s749_s2 + $0x28] sm:$0xff]  ;;  %vm212_vm0 = vcmask 523264  }
  0x16   :  { %464 = vset.pattern.permute.xlu2 %v605_v0  ;;  %463 = vset.pattern.permute.xlu1 %v605_v0  ;;  %s447_s24 = sld [smem:[#allocation2 + $0x3]]  ;;  %v97_v3 = vld [vmem:[%s749_s2] sm:$0xff]  ;;  %v100_v10 = vld [vmem:[%s749_s2 + $0x18] sm:$0xff]  ;;  %v98_v13 = vld [vmem:[%s749_s2 + $0x8] sm:$0xff]  ;;  %s606_s16 = smov [#allocation10]  }
  0x17   :  { %462 = vset.pattern.permute.xlu0 %v605_v0  ;;  %s448_s30 = sld [smem:[#allocation2 + $0x4]]  ;;  %v104_v22 = vld [vmem:[%s749_s2 + $0x38] sm:$0xff]  ;;  %v103_v23 = vld [vmem:[%s749_s2 + $0x30] sm:$0xff]  ;;  %v96_v45 = vld [vmem:[#allocation6] sm:$0x1]  ;;  %s431_s17 = sshll.u32 %s606_s16, 4  ;;  %s432_s17 = int_to_ptr.vmem [resolvable:$true] %s431_s17 }
  0x18   :  { %s449_s15 = sld [smem:[#allocation2 + $0x5]]  ;;  %v201_v59 = vld [vmem:[%s750_s3 + $0x28] sm:$0xff]  ;;  %v200_v63 = vld [vmem:[%s750_s3 + $0x20] sm:$0xff] }
  0x19   :  { %s88_s2 = sld [smem:[#allocation2]]  ;;  %v197_v60 = vld [vmem:[%s750_s3 + $0x8] sm:$0xff]  ;;  %v196_v0 = vld [vmem:[%s750_s3] sm:$0xff] }
  0x1a   :  { %s445_s19 = sld [smem:[#allocation2 + $0x1]] }
  0x1b   :  { %v109_v4 = vstv %s446_s1  ;;  %s451_s11 = sld [smem:[#allocation2 + $0x7]] }
  0x1c   :  { %v114_v5 = vmul.f32 %v109_v4, %v101_v1  ;;  %v118_v6 = vstv %s447_s24  ;;  %v112_v7 = vmul.f32 %v109_v4, %v99_v2  ;;  %v110_v8 = vmul.f32 %v109_v4, %v97_v3 }
  0x1d   :  { %v115_v15 = vmul.f32 %v109_v4, %v102_v9  ;;  %v113_v16 = vmul.f32 %v109_v4, %v100_v10  ;;  %v111_v17 = vmul.f32 %v109_v4, %v98_v13  ;;  %v127_v20 = vstv %s448_s30 }
  0x1e   :  { %v123_v11 = vadd.f32 %v118_v6, %v114_v5  ;;  %v121_v12 = vadd.f32 %v118_v6, %v112_v7  ;;  %v119_v14 = vadd.f32 %v118_v6, %v110_v8  ;;  %v128_v24 = vmul.f32 %v127_v20, %v97_v3 }
  0x1f   :  { %v124_v18 = vadd.f32 %v118_v6, %v115_v15  ;;  %v122_v19 = vadd.f32 %v118_v6, %v113_v16  ;;  %v120_v21 = vadd.f32 %v118_v6, %v111_v17  ;;  %v117_v25 = vmul.f32 %v109_v4, %v104_v22 }
  0x20   :  { %167 = vperm.xlu2 %464, %v123_v11   ;;  %157 = vperm.xlu1 %463, %v121_v12   ;;  %v136_v26 = vstv %s449_s15  ;;  %v116_v27 = vmul.f32 %v109_v4, %v103_v23  ;;  %v130_v31 = vmul.f32 %v127_v20, %v99_v2  ;;  %v131_v32 = vmul.f32 %v127_v20, %v100_v10  ;;  %v199_v4 = vld [vmem:[%s750_s3 + $0x18] sm:$0xff] }
  0x21   :  { %147 = vperm.xlu0 %462, %v119_v14   ;;  %v137_v28 = vadd.f32 %v136_v26, %v128_v24  ;;  %v126_v29 = vadd.f32 %v118_v6, %v117_v25  ;;  %v129_v33 = vmul.f32 %v127_v20, %v98_v13  ;;  %v134_v37 = vmul.f32 %v127_v20, %v103_v23  ;;  %v202_v13 = vld [vmem:[%s750_s3 + $0x30] sm:$0xff] }
  0x22   :  { %v125_v30 = vadd.f32 %v118_v6, %v116_v27  ;;  %v140_v34 = vadd.f32 %v136_v26, %v131_v32  ;;  %v139_v35 = vadd.f32 %v136_v26, %v130_v31  ;;  %v133_v38 = vmul.f32 %v127_v20, %v102_v9  ;;  %v198_v6 = vld [vmem:[%s750_s3 + $0x10] sm:$0xff]  ;;  %v203_v9 = vld [vmem:[%s750_s3 + $0x38] sm:$0xff]  ;;  %s450_s3 = sld [smem:[#allocation2 + $0x6]] }
  0x23   :  { %v138_v36 = vadd.f32 %v136_v26, %v129_v33  ;;  %v132_v39 = vmul.f32 %v127_v20, %v101_v1  ;;  %v143_v40 = vadd.f32 %v136_v26, %v134_v37  ;;  %v135_v43 = vmul.f32 %v127_v20, %v104_v22 }
  0x24   :  { %v142_v41 = vadd.f32 %v136_v26, %v133_v38  ;;  %v105_v46 = vstv %s88_s2  ;;  %v107_v50 = vstv %s445_s19  ;;  %s433_s2 = sshll.u32 %s755_s8, 4  ;;  %s434_s2 = int_to_ptr.hbm [resolvable:$true] %s433_s2 }
  0x25   :  { %v141_v42 = vadd.f32 %v136_v26, %v132_v39  ;;  %v144_v44 = vadd.f32 %v136_v26, %v135_v43  ;;  %v106_v48 = vmul.f32 %v105_v46, %v96_v45 }
  0x27   :  { %v108_v52 = vadd.f32 %v107_v50, %v106_v48 }
  0x28   :  { %172 = vperm.xlu2 %464, %v124_v18   ;;  %162 = vperm.xlu1 %463, %v122_v19  }
  0x29   :  { %152 = vperm.xlu0 %462, %v120_v21   ;;  %v186_v53 = vperm.slane %v108_v52, 0 }
  0x30   :  { %290 = vperm.xlu2 %464, %v137_v28   ;;  %182 = vperm.xlu1 %463, %v126_v29  }
  0x31   :  { %177 = vperm.xlu0 %462, %v125_v30  }
  0x38   :  { %305 = vperm.xlu2 %464, %v140_v34   ;;  %300 = vperm.xlu1 %463, %v139_v35  }
  0x39   :  { %295 = vperm.xlu0 %462, %v138_v36  }
  0x40   :  { %320 = vperm.xlu2 %464, %v143_v40   ;;  %315 = vperm.xlu1 %463, %v142_v41  }
  0x41   :  { %310 = vperm.xlu0 %462, %v141_v42  }
  0x49   :  { %325 = vperm.xlu0 %462, %v144_v44  }
  0x7a   :  { %v168_v47 = vpop.permute.xlu2 %167 }
  0x7b   :  { %v192_v61 = vmul.f32 %v186_v53, %v168_v47 }
  0x7d   :  { %v208_v7 = vadd.f32 %v200_v63, %v192_v61 }
  0x7f   :  { %v217_v20 = vsel %vm212_vm0, %v208_v7, -inf }
  0x82   :  { %v173_v55 = vpop.permute.xlu2 %172 }
  0x83   :  { %v193_v57 = vmul.f32 %v186_v53, %v173_v55 }
  0x85   :  { %v209_v2 = vadd.f32 %v201_v59, %v193_v57 }
  0x87   :  { %v219_v15 = vsel %vm212_vm0, %v209_v2, -inf }
  0x92   :  { %v158_v49 = vpop.permute.xlu1 %157 }
  0x93   :  { %v148_v51 = vpop.permute.xlu0 %147  ;;  %v190_v3 = vmul.f32 %v186_v53, %v158_v49 }
  0x94   :  { %v188_v62 = vmul.f32 %v186_v53, %v148_v51 }
  0x95   :  { %v206_v16 = vadd.f32 %v198_v6, %v190_v3 }
  0x96   :  { %v204_v8 = vadd.f32 %v196_v0, %v188_v62 }
  0x97   :  { %v215_v26 = vsel %vm212_vm0, %v206_v16, -inf }
  0x98   :  { %v213_v21 = vsel %vm212_vm0, %v204_v8, -inf }
  0x99   :  { %v218_v29 = vmax.f32 %v213_v21, %v217_v20  ;;  %v368_v21 = vld [vmem:[#allocation7 + $0x38] sm:$0xff] }
  0x9a   :  { %v163_v54 = vpop.permute.xlu1 %162  ;;  %381 = vmatpush.msra.mxu0 %v368_v21  ;;  %v394_v21 = vld [vmem:[#allocation9 + $0x8] sm:$0xff] }
  0x9b   :  { %v153_v56 = vpop.permute.xlu0 %152  ;;  %v191_v1 = vmul.f32 %v186_v53, %v163_v54 }
  0x9c   :  { %v189_v58 = vmul.f32 %v186_v53, %v153_v56 }
  0x9d   :  { %v207_v11 = vadd.f32 %v199_v4, %v191_v1 }
  0x9e   :  { %v205_v5 = vadd.f32 %v197_v60, %v189_v58 }
  0x9f   :  { %v216_v23 = vsel %vm212_vm0, %v207_v11, -inf }
  0xa0   :  { %v214_v17 = vsel %vm212_vm0, %v205_v5, -inf }
  0xa1   :  { %v220_v24 = vmax.f32 %v214_v17, %v219_v15 }
  0xa2   :  { %v183_v10 = vpop.permute.xlu1 %182 }
  0xa3   :  { %v195_v12 = vmul.f32 %v186_v53, %v183_v10  ;;  %v178_v14 = vpop.permute.xlu0 %177  ;;  %v225_v31 = vmax.f32 %v218_v29, %v220_v24  ;;  %v367_v24 = vld [vmem:[#allocation7 + $0x30] sm:$0xff] }
  0xa4   :  { %v194_v18 = vmul.f32 %v186_v53, %v178_v14  ;;  %382 = vmatpush.msra.mxu0 %v367_v24  ;;  %v363_v29 = vld [vmem:[#allocation7 + $0x10] sm:$0xff] }
  0xa5   :  { %v211_v19 = vadd.f32 %v203_v9, %v195_v12 }
  0xa6   :  { %v210_v22 = vadd.f32 %v202_v13, %v194_v18 }
  0xa7   :  { %v223_v25 = vsel %vm212_vm0, %v211_v19, -inf }
  0xa8   :  { %v224_v27 = vmax.f32 %v216_v23, %v223_v25  ;;  %v221_v28 = vsel %vm212_vm0, %v210_v22, -inf  ;;  %v366_v25 = vld [vmem:[#allocation7 + $0x28] sm:$0xff] }
  0xa9   :  { %v222_v30 = vmax.f32 %v215_v26, %v221_v28  ;;  %383 = vmatpush.msra.mxu0 %v366_v25  ;;  %v365_v26 = vld [vmem:[#allocation7 + $0x20] sm:$0xff] }
  0xaa   :  { %v301_v28 = vpop.permute.xlu1 %300 }
  0xab   :  { %v226_v32 = vmax.f32 %v222_v30, %v224_v27  ;;  %v296_v23 = vpop.permute.xlu0 %295  ;;  %v364_v27 = vld [vmem:[#allocation7 + $0x18] sm:$0xff]  ;;  %384 = vmatpush.msra.mxu0 %v365_v26 }
  0xac   :  { %v401_v26 = vld [vmem:[%s754_s7] sm:$0x1] }
  0xad   :  { %v227_v33 = vmax.f32 %v225_v31, %v226_v32  ;;  %385 = vmatpush.msra.mxu0 %v364_v27 }
  0xaf   :  { %v228_v34 = vrot.slane %v227_v33, 4  ;;  %386 = vmatpush.msra.mxu0 %v363_v29 }
  0xb1   :  { %v229_v35 = vmax.f32 %v227_v33, %v228_v34 }
  0xb3   :  { %v230_v36 = vrot.slane %v229_v35, 2 }
  0xb5   :  { %v231_v37 = vmax.f32 %v229_v35, %v230_v36  ;;  %v362_v35 = vld [vmem:[#allocation7 + $0x8] sm:$0xff]  ;;  %v311_v36 = vpop.permute.xlu0 %310 }
  0xb6   :  { %387 = vmatpush.msra.mxu0 %v362_v35 }
  0xb7   :  { %v232_v38 = vrot.slane %v231_v37, 1 }
  0xb9   :  { %v233_v39 = vmax.f32 %v231_v37, %v232_v38 }
  0xbb   :  { %v234_v40 = vsub.f32 %v204_v8, %v233_v39  ;;  %v235_v41 = vsub.f32 %v205_v5, %v233_v39  ;;  %v236_v42 = vsub.f32 %v206_v16, %v233_v39  ;;  %v237_v43 = vsub.f32 %v207_v11, %v233_v39 }
  0xbc   :  { %v238_v45 = vsub.f32 %v208_v7, %v233_v39  ;;  %v239_v48 = vsub.f32 %v209_v2, %v233_v39  ;;  %v240_v50 = vsub.f32 %v210_v22, %v233_v39  ;;  %v241_v52 = vsub.f32 %v211_v19, %v233_v39  ;;  %v291_v19 = vpop.permute.xlu2 %290 }
  0xbd   :  { %v242_v44 = vmul.f32 1.442695, %v234_v40  ;;  %v244_v46 = vmul.f32 1.442695, %v235_v41  ;;  %v246_v47 = vmul.f32 1.442695, %v236_v42 }
  0xbe   :  { %v248_v49 = vmul.f32 1.442695, %v237_v43  ;;  %v250_v51 = vmul.f32 1.442695, %v238_v45  ;;  %v252_v53 = vmul.f32 1.442695, %v239_v48 }
  0xbf   :  { %465 = vpow2.f32 %v242_v44  ;;  %v254_v54 = vmul.f32 1.442695, %v240_v50  ;;  %v256_v57 = vmul.f32 1.442695, %v241_v52  ;;  %v361_v42 = vld [vmem:[#allocation7] sm:$0xff]  ;;  %v400_v43 = vld [vmem:[#allocation9 + $0x38] sm:$0xff] }
  0xc0   :  { %467 = vpow2.f32 %v244_v46  ;;  %v399_v44 = vld [vmem:[#allocation9 + $0x30] sm:$0xff]  ;;  %413 = vmatpush.msra.mxu1 %v400_v43  ;;  %388 = vmatpush.msra.mxu0 %v361_v42  ;;  %v398_v50 = vld [vmem:[#allocation9 + $0x28] sm:$0xff] }
  0xc1   :  { %469 = vpow2.f32 %v246_v47 }
  0xc2   :  { %471 = vpow2.f32 %v248_v49  ;;  %414 = vmatpush.msra.mxu1 %v399_v44 }
  0xc3   :  { %473 = vpow2.f32 %v250_v51 }
  0xc4   :  { %475 = vpow2.f32 %v252_v53  ;;  %v306_v31 = vpop.permute.xlu2 %305  ;;  %415 = vmatpush.msra.mxu1 %v398_v50 }
  0xc5   :  { %v466_v55 = vpop.eup %465  ;;  %477 = vpow2.f32 %v254_v54 }
  0xc6   :  { %v468_v56 = vpop.eup %467  ;;  %v258_v58 = vsel %vm212_vm0, %v466_v55, 0.0  ;;  %479 = vpow2.f32 %v256_v57 }
  0xc7   :  { %v470_v59 = vpop.eup %469  ;;  %v259_v60 = vsel %vm212_vm0, %v468_v56, 0.0 }
  0xc8   :  { %v472_v61 = vpop.eup %471  ;;  %v260_v62 = vadd.f32 %v259_v60, %v258_v58  ;;  %v261_v63 = vsel %vm212_vm0, %v470_v59, 0.0 }
  0xc9   :  { %v474_v0 = vpop.eup %473  ;;  %v263_v2 = vsel %vm212_vm0, %v472_v61, 0.0 }
  0xca   :  { %v262_v1 = vadd.f32 %v261_v63, %v260_v62  ;;  %v476_v3 = vpop.eup %475  ;;  %v265_v5 = vsel %vm212_vm0, %v474_v0, 0.0  ;;  %v396_v62 = vld [vmem:[#allocation9 + $0x18] sm:$0xff] }
  0xcb   :  { %v478_v6 = vpop.eup %477  ;;  %v267_v8 = vsel %vm212_vm0, %v476_v3, 0.0 }
  0xcc   :  { %v264_v4 = vadd.f32 %v263_v2, %v262_v1  ;;  %v480_v9 = vpop.eup %479  ;;  %v269_v11 = vsel %vm212_vm0, %v478_v6, 0.0  ;;  %v321_v60 = vpop.permute.xlu2 %320 }
  0xcd   :  { %v271_v13 = vsel %vm212_vm0, %v480_v9, 0.0  ;;  %v326_v2 = vpop.permute.xlu0 %325 }
  0xce   :  { %v266_v7 = vadd.f32 %v265_v5, %v264_v4 }
  0xd0   :  { %v268_v10 = vadd.f32 %v267_v8, %v266_v7 }
  0xd2   :  { %v270_v12 = vadd.f32 %v269_v11, %v268_v10 }
  0xd4   :  { %v272_v14 = vadd.f32 %v271_v13, %v270_v12 }
  0xd6   :  { %v273_v15 = vrot.slane %v272_v14, 4 }
  0xd8   :  { %v274_v16 = vadd.f32 %v273_v15, %v272_v14 }
  0xda   :  { %v275_v17 = vrot.slane %v274_v16, 2 }
  0xdc   :  { %v276_v18 = vadd.f32 %v275_v17, %v274_v16  ;;  %v357_v16 = vstv %s450_s3 }
  0xde   :  { %v277_v20 = vrot.slane %v276_v18, 1 }
  0xe0   :  { %v278_v22 = vadd.f32 %v277_v20, %v276_v18  ;;  %v359_v18 = vstv %s451_s11 }
  0xe2   :  { %481 = vrcp.f32 %v278_v22  ;;  %v393_v22 = vld [vmem:[#allocation9] sm:$0xff] }
  0xe8   :  { %v482_v30 = vpop.eup %481 }
  0xe9   :  { %v282_v32 = vmul.f32 %v482_v30, %v470_v59  ;;  %v280_v33 = vmul.f32 %v482_v30, %v466_v55  ;;  %v281_v34 = vmul.f32 %v482_v30, %v468_v56  ;;  %v283_v37 = vmul.f32 %v482_v30, %v472_v61  ;;  %v316_v55 = vpop.permute.xlu1 %315  ;;  %v397_v56 = vld [vmem:[#allocation9 + $0x20] sm:$0xff] }
  0xea   :  { %v284_v41 = vmul.f32 %v482_v30, %v474_v0  ;;  %v285_v47 = vmul.f32 %v482_v30, %v476_v3  ;;  %v286_v53 = vmul.f32 %v482_v30, %v478_v6  ;;  %v287_v59 = vmul.f32 %v482_v30, %v480_v9  ;;  %416 = vmatpush.msra.mxu1 %v397_v56  ;;  %v395_v3 = vld [vmem:[#allocation9 + $0x10] sm:$0xff] }
  0xeb   :  { %v330_v38 = vmul.f32 %v301_v28, %v282_v32  ;;  %v328_v39 = vmul.f32 %v291_v19, %v280_v33  ;;  %v329_v40 = vmul.f32 %v296_v23, %v281_v34  ;;  %v331_v48 = vmul.f32 %v306_v31, %v283_v37  ;;  %v369_v23 = vld [vmem:[%s752_s5] sm:$0x1] }
  0xec   :  { %v332_v52 = vmul.f32 %v311_v36, %v284_v41  ;;  %v333_v57 = vmul.f32 %v316_v55, %v285_v47  ;;  %v334_v0 = vmul.f32 %v321_v60, %v286_v53  ;;  %v335_v5 = vmul.f32 %v326_v2, %v287_v59  ;;  %417 = vmatpush.msra.mxu1 %v396_v62 }
  0xed   :  { %v336_v45 = vsel %vm212_vm0, %v328_v39, 0.0  ;;  %v337_v46 = vsel %vm212_vm0, %v329_v40, 0.0  ;;  %v339_v51 = vsel %vm212_vm0, %v330_v38, 0.0  ;;  %v341_v58 = vsel %vm212_vm0, %v331_v48, 0.0 }
  0xee   :  { %v338_v49 = vadd.f32 %v337_v46, %v336_v45  ;;  %v343_v63 = vsel %vm212_vm0, %v332_v52, 0.0  ;;  %v345_v4 = vsel %vm212_vm0, %v333_v57, 0.0  ;;  %v347_v7 = vsel %vm212_vm0, %v334_v0, 0.0  ;;  %418 = vmatpush.msra.mxu1 %v395_v3 }
  0xef   :  { %v349_v9 = vsel %vm212_vm0, %v335_v5, 0.0 }
  0xf0   :  { %v340_v54 = vadd.f32 %v339_v51, %v338_v49  ;;  %419 = vmatpush.msra.mxu1 %v394_v21 }
  0xf2   :  { %v342_v61 = vadd.f32 %v341_v58, %v340_v54  ;;  %420 = vmatpush.msra.mxu1 %v393_v22 }
  0xf4   :  { %v344_v1 = vadd.f32 %v343_v63, %v342_v61 }
  0xf6   :  { %v346_v6 = vadd.f32 %v345_v4, %v344_v1 }
  0xf8   :  { %v348_v8 = vadd.f32 %v347_v7, %v346_v6 }
  0xfa   :  { %v350_v10 = vadd.f32 %v349_v9, %v348_v8 }
  0xfc   :  { %v351_v11 = vrot.slane %v350_v10, 4 }
  0xfe   :  { %v352_v12 = vadd.f32 %v351_v11, %v350_v10 }
 0x100   :  { %v353_v13 = vrot.slane %v352_v12, 2 }
 0x102   :  { %v354_v14 = vadd.f32 %v353_v13, %v352_v12 }
 0x104   :  { %v355_v15 = vrot.slane %v354_v14, 1 }
 0x106   :  { %v356_v17 = vadd.f32 %v355_v15, %v354_v14 }
 0x108   :  { %v358_v19 = vmul.f32 %v357_v16, %v356_v17 }
 0x10a   :  { %v360_v20 = vadd.f32 %v359_v18, %v358_v19 }
 0x10c   :  { %452 = vmatmul.msk.f32.vlgmr.msra.gmra.mxu0 %vm212_vm0, %v360_v20 }
 0x189   :  { %v390_v24 = vpop.f32.mrf.mxu0 }
 0x18a   :  { %v391_v25 = vadd.f32 %v390_v24, %v369_v23 }
 0x18c   :  { %453 = vmatmul.msk.f32.vlgmr.msra.gmra.mxu1 %vm212_vm0, %v391_v25 }
 0x209   :  { %v422_v27 = vpop.f32.mrf.mxu1 }
 0x20a   :  { %v423_v28 = vadd.f32 %v422_v27, %v401_v26 }
 0x20c   :  { %425 = vst [vmem:[#allocation10] sm:$0x1] %v423_v28 }
 0x20d   :  { %436 = dma.vmem_to_hbm [thread:$0]  %s432_s17, 16, %s434_s2, [#allocation4]  }
 0x20e   :  { %597 = dma.done.wait [#allocation4], 16  }
 0x20f   :  { %598 = vsyncadd [#allocation4], 4294967280 }
 0x210   :  { %441 = vsyncpa [#allocation3], 1 }
 0x211   :  { %442 = vsyncpa [#allocation8], 1 }
 0x212   :  { %443 = vsyncpa [#allocation4], 1 }
 0x213   :  { %444 = vsyncpa [#allocation5], 1 }

</bundles_post_ra>
